<compile_context>
chip_gen: v7x
topology: tpu7x:2x2x1
jax: 0.10.0
libtpu: 0.0.40
codegen_flags: <defaults>
</compile_context>

<pallas_src>
import jax
import jax.numpy as jnp
from jax.experimental import pallas as pl
from jax.experimental.pallas import tpu as pltpu


X_DIM = 784  # fixed by the module (28*28 MNIST)


def _round_up(n, m):
    return ((n + m - 1) // m) * m


def _vae_kernel(nb_ref,                        # SMEM (1,) int32: true batch size
                x_ref, eps_ref,                # [TM, 784] f32, [TM, Z] f32
                w1_ref, b1_ref,                # encoder hidden     (w bf16, b f32)
                wm_ref, bm_ref,                # encoder mean head
                ws_ref, bs_ref,                # encoder std head
                wd1_ref, bd1_ref,              # decoder hidden
                wd2_ref, bd2_ref,              # decoder output head
                loss_ref):                     # (1,1,1) f32 partial-loss block (per slice)
    c = pl.program_id(0)                       # batch slice (parallel across cores)
    i = pl.program_id(1)                       # row tile within slice (sequential)
    tm = x_ref.shape[0]

    x = x_ref[...]                             # f32 [TM, 784]
    eps = eps_ref[...]                         # f32 [TM, Z]

    # ---------------- Encoder (bf16 MXU, f32 accumulation) ----------------
    h = jnp.tanh(
        jnp.dot(x.astype(jnp.bfloat16), w1_ref[...],
                preferred_element_type=jnp.float32) + b1_ref[...]
    )                                          # [TM, Hp]
    hb = h.astype(jnp.bfloat16)
    mean_enc = jnp.dot(hb, wm_ref[...],
                       preferred_element_type=jnp.float32) + bm_ref[...]       # [TM, Z]
    sigma_enc = jax.nn.softplus(
        jnp.dot(hb, ws_ref[...], preferred_element_type=jnp.float32) + bs_ref[...]
    )                                          # [TM, Z], > 0

    # ------------- Reparameterization -------------
    z = sigma_enc * eps + mean_enc             # [TM, Z]

    # ---------------- Decoder ----------------
    hd = jnp.tanh(
        jnp.dot(z.astype(jnp.bfloat16), wd1_ref[...],
                preferred_element_type=jnp.float32) + bd1_ref[...]
    )                                          # [TM, Hp]
    logits = jnp.dot(hd.astype(jnp.bfloat16), wd2_ref[...],
                     preferred_element_type=jnp.float32) + bd2_ref[...]        # [TM, 784]

    # ---------------- Losses ----------------
    # Bernoulli NLL from logits:  -[x*log(p) + (1-x)*log(1-p)] = softplus(a) - x*a
    neg_recon = jnp.sum(jax.nn.softplus(logits) - x * logits,
                        axis=-1, keepdims=True)                                # [TM, 1]

    # KL(q(z|x) || N(0, I)) per example, using 2*log(sigma) == log(sigma^2)
    kl = -0.5 * jnp.sum(
        1.0 + 2.0 * jnp.log(sigma_enc) - mean_enc * mean_enc - sigma_enc * sigma_enc,
        axis=-1, keepdims=True,
    )                                                                          # [TM, 1]

    # In-kernel row mask: padded rows contribute 0 to the loss.
    row0 = (c * pl.num_programs(1) + i) * tm
    rows = row0 + jax.lax.broadcasted_iota(jnp.int32, (tm, 1), 0)
    mask = (rows < nb_ref[0]).astype(jnp.float32)

    tile_loss = jnp.sum((neg_recon + kl) * mask)

    @pl.when(i == 0)
    def _():
        loss_ref[...] = jnp.zeros_like(loss_ref)

    loss_ref[...] += tile_loss


def vae_forward(x, eps, params, *, block_m=1024, num_slices=2):
    """x: [B, 784] f32, eps: [B, z_dim] f32. Returns the negative average ELBO."""
    b, x_dim = x.shape
    z_dim = eps.shape[1]
    hidden_p = params["w1"].shape[1]

    # Row-tile size: keep the (large) default for production batches, only
    # shrink when the per-slice batch itself is smaller than one tile.
    block_m = max(8, min(block_m, _round_up(pl.cdiv(b, num_slices), 8)))
    tiles_per_slice = pl.cdiv(b, num_slices * block_m)
    padded_b = num_slices * tiles_per_slice * block_m
    pad = padded_b - b
    if pad:
        x = jnp.pad(x, ((0, pad), (0, 0)))
        eps = jnp.pad(eps, ((0, pad), (0, 0)))
    nb = jnp.array([b], dtype=jnp.int32)

    grid = (num_slices, tiles_per_slice)

    def row_spec(feat):
        return pl.BlockSpec((block_m, feat),
                            lambda c, i: (c * tiles_per_slice + i, 0))

    def resident(arr):   # whole array, same block for every grid step -> stays in VMEM
        return pl.BlockSpec(arr.shape, lambda c, i: (0, 0))

    w_args = (params["w1"], params["b1"],
              params["wm"], params["bm"],
              params["ws"], params["bs"],
              params["wd1"], params["bd1"],
              params["wd2"], params["bd2"])

    flops = 2 * padded_b * (2 * x_dim * hidden_p + 3 * hidden_p * z_dim)
    transcendentals = padded_b * (2 * hidden_p + 2 * z_dim + x_dim)
    bytes_accessed = int(x.size * 4 + eps.size * 4 + nb.size * 4
                         + sum(int(w.size) * w.dtype.itemsize for w in w_args)
                         + num_slices * 4)

    cp_kwargs = dict(dimension_semantics=("parallel", "arbitrary"))
    if block_m >= 512:
        # Large row tiles need more scoped VMEM than v5e's 16 MiB default;
        # 48 MiB still leaves headroom on v7x's 64 MiB-per-TC physical VMEM.
        cp_kwargs["vmem_limit_bytes"] = 48 * 1024 * 1024

    loss_parts = pl.pallas_call(
        _vae_kernel,
        out_shape=jax.ShapeDtypeStruct((num_slices, 1, 1), jnp.float32),
        grid=grid,
        in_specs=[pl.BlockSpec(memory_space=pltpu.MemorySpace.SMEM),
                  row_spec(x_dim), row_spec(z_dim)]
                 + [resident(w) for w in w_args],
        out_specs=pl.BlockSpec((1, 1, 1), lambda c, i: (c, 0, 0)),
        compiler_params=pltpu.CompilerParams(**cp_kwargs),
        cost_estimate=pl.CostEstimate(flops=flops,
                                      transcendentals=transcendentals,
                                      bytes_accessed=bytes_accessed),
    )(nb, x, eps, *w_args)

    return jnp.sum(loss_parts) / b


def init_params(key, hidden_dim=500, z_dim=20):
    """PyTorch-Linear-style init (U[-1/sqrt(fan_in), 1/sqrt(fan_in)]), weights
    stored [in, out]. The hidden dim is zero-padded to a multiple of 128 lanes
    (numerically exact). All weight matrices are bf16 for the MXU; biases f32."""
    hp = _round_up(hidden_dim, 128)

    def linear(k, fan_in, fan_out):
        k_w, k_b = jax.random.split(k)
        bound = float(fan_in) ** -0.5
        w = jax.random.uniform(k_w, (fan_in, fan_out), jnp.float32, -bound, bound)
        b = jax.random.uniform(k_b, (1, fan_out), jnp.float32, -bound, bound)
        return w, b

    keys = jax.random.split(key, 5)
    w1, b1 = linear(keys[0], X_DIM, hidden_dim)       # encoder.layerH
    wm, bm = linear(keys[1], hidden_dim, z_dim)       # encoder.layerMean
    ws, bs = linear(keys[2], hidden_dim, z_dim)       # encoder.layerStd
    wd1, bd1 = linear(keys[3], z_dim, hidden_dim)     # decoder.layerH1
    wd2, bd2 = linear(keys[4], hidden_dim, X_DIM)     # decoder.layerH2

    ph = hp - hidden_dim
    w1 = jnp.pad(w1, ((0, 0), (0, ph)))
    b1 = jnp.pad(b1, ((0, 0), (0, ph)))
    wm = jnp.pad(wm, ((0, ph), (0, 0)))
    ws = jnp.pad(ws, ((0, ph), (0, 0)))
    wd1 = jnp.pad(wd1, ((0, 0), (0, ph)))
    bd1 = jnp.pad(bd1, ((0, 0), (0, ph)))
    wd2 = jnp.pad(wd2, ((0, ph), (0, 0)))

    bf = jnp.bfloat16
    return dict(w1=w1.astype(bf), b1=b1,
                wm=wm.astype(bf), bm=bm,
                ws=ws.astype(bf), bs=bs,
                wd1=wd1.astype(bf), bd1=bd1,
                wd2=wd2.astype(bf), bd2=bd2)


def ref_forward(x, eps, p):
    """Pure-JAX reference mirroring the PyTorch VAE.forward formulation
    (sigmoid + logs, log(sigma^2)) with the same bf16 weight casts."""
    h = jnp.tanh(jnp.dot(x.astype(jnp.bfloat16), p["w1"],
                         preferred_element_type=jnp.float32) + p["b1"])
    hb = h.astype(jnp.bfloat16)
    mean_e = jnp.dot(hb, p["wm"], preferred_element_type=jnp.float32) + p["bm"]
    std_e = jax.nn.softplus(
        jnp.dot(hb, p["ws"], preferred_element_type=jnp.float32) + p["bs"])
    z = std_e * eps + mean_e
    hd = jnp.tanh(jnp.dot(z.astype(jnp.bfloat16), p["wd1"],
                          preferred_element_type=jnp.float32) + p["bd1"])
    md = jax.nn.sigmoid(jnp.dot(hd.astype(jnp.bfloat16), p["wd2"],
                                preferred_element_type=jnp.float32) + p["bd2"])
    pr = jnp.sum(x * jnp.log(md) + (1.0 - x) * jnp.log(1.0 - md), axis=-1)
    recon = -jnp.mean(pr)
    reg = jnp.mean(-0.5 * jnp.sum(1.0 + jnp.log(std_e ** 2)
                                  - mean_e ** 2 - std_e ** 2, axis=-1))
    return recon + reg


if __name__ == "__main__":
    batch = 12          # not a multiple of the tile -> exercises padding + masking
    hidden_dim = 64     # padded to 128 lanes inside init_params
    z_dim = 16

    root = jax.random.PRNGKey(0)
    k_params, k_x, k_eps = jax.random.split(root, 3)

    params = init_params(k_params, hidden_dim, z_dim)
    # Normalized "MNIST"-like input in (0, 1).
    x = jax.random.uniform(k_x, (batch, X_DIM), jnp.float32, 0.05, 0.95)
    eps = jax.random.normal(k_eps, (batch, z_dim), jnp.float32)

    # grid = (2 slices, 1 tile each); slice 1 is half-masked (rows 12..15 padded).
    neg_elbo = vae_forward(x, eps, params, block_m=8, num_slices=2)
    jax.block_until_ready(neg_elbo)

    ref = ref_forward(x, eps, params)
    assert jnp.allclose(neg_elbo, ref, rtol=1e-3, atol=1e-3), (neg_elbo, ref)
    print("KERNEL_OK")
</pallas_src>

<mosaic_0001>
module attributes {stable_mosaic.version = 11 : i64} {
  func.func @_vae_kernel(%arg0: i32, %arg1: i32, %arg2: memref<1xi32, #tpu.memory_space<smem>>, %arg3: memref<8x784xf32, #tpu.memory_space<vmem>>, %arg4: memref<8x16xf32, #tpu.memory_space<vmem>>, %arg5: memref<784x128xbf16, #tpu.memory_space<vmem>>, %arg6: memref<1x128xf32, #tpu.memory_space<vmem>>, %arg7: memref<128x16xbf16, #tpu.memory_space<vmem>>, %arg8: memref<1x16xf32, #tpu.memory_space<vmem>>, %arg9: memref<128x16xbf16, #tpu.memory_space<vmem>>, %arg10: memref<1x16xf32, #tpu.memory_space<vmem>>, %arg11: memref<16x128xbf16, #tpu.memory_space<vmem>>, %arg12: memref<1x128xf32, #tpu.memory_space<vmem>>, %arg13: memref<128x784xbf16, #tpu.memory_space<vmem>>, %arg14: memref<1x784xf32, #tpu.memory_space<vmem>>, %arg15: memref<1x1x1xf32, #tpu.memory_space<vmem>>) attributes {dimension_semantics = [#tpu.dimension_semantics<parallel>, #tpu.dimension_semantics<arbitrary>], iteration_bounds = array<i64: 2, 1>, scalar_prefetch = 0 : i64, scratch_operands = 0 : i64, tpu.core_type = #tpu.core_type<tc>, window_params = [{transform_indices = @transform_0, window_bounds = array<i64: 1>}, {transform_indices = @transform_1, window_bounds = array<i64: 8, 784>}, {transform_indices = @transform_2, window_bounds = array<i64: 8, 16>}, {pipeline_mode = #tpu.pipeline_mode<synchronous>, transform_indices = @transform_3, window_bounds = array<i64: 784, 128>}, {pipeline_mode = #tpu.pipeline_mode<synchronous>, transform_indices = @transform_4, window_bounds = array<i64: 1, 128>}, {pipeline_mode = #tpu.pipeline_mode<synchronous>, transform_indices = @transform_5, window_bounds = array<i64: 128, 16>}, {pipeline_mode = #tpu.pipeline_mode<synchronous>, transform_indices = @transform_6, window_bounds = array<i64: 1, 16>}, {pipeline_mode = #tpu.pipeline_mode<synchronous>, transform_indices = @transform_7, window_bounds = array<i64: 128, 16>}, {pipeline_mode = #tpu.pipeline_mode<synchronous>, transform_indices = @transform_8, window_bounds = array<i64: 1, 16>}, {pipeline_mode = #tpu.pipeline_mode<synchronous>, transform_indices = @transform_9, window_bounds = array<i64: 16, 128>}, {pipeline_mode = #tpu.pipeline_mode<synchronous>, transform_indices = @transform_10, window_bounds = array<i64: 1, 128>}, {pipeline_mode = #tpu.pipeline_mode<synchronous>, transform_indices = @transform_11, window_bounds = array<i64: 128, 784>}, {pipeline_mode = #tpu.pipeline_mode<synchronous>, transform_indices = @transform_12, window_bounds = array<i64: 1, 784>}, {transform_indices = @transform_13, window_bounds = array<i64: 1, 1, 1>}]} {
    %c0 = arith.constant 0 : index
    %c0_0 = arith.constant 0 : index
    %0 = vector.load %arg3[%c0, %c0_0] : memref<8x784xf32, #tpu.memory_space<vmem>>, vector<8x784xf32>
    %c0_1 = arith.constant 0 : index
    %c0_2 = arith.constant 0 : index
    %1 = vector.load %arg4[%c0_1, %c0_2] : memref<8x16xf32, #tpu.memory_space<vmem>>, vector<8x16xf32>
    %2 = arith.truncf %0 : vector<8x784xf32> to vector<8x784xbf16>
    %c0_3 = arith.constant 0 : index
    %c0_4 = arith.constant 0 : index
    %3 = vector.load %arg5[%c0_3, %c0_4] : memref<784x128xbf16, #tpu.memory_space<vmem>>, vector<784x128xbf16>
    %cst = arith.constant dense<0.000000e+00> : vector<8x128xf32>
    %4 = tpu.matmul %2, %3, %cst {dimension_numbers = #tpu.dot_dimension_numbers<[1], [0], [0], [1], [0, 0, 1, 1], [], []>} : vector<8x784xbf16>, vector<784x128xbf16>, vector<8x128xf32> -> vector<8x128xf32>
    %c0_5 = arith.constant 0 : index
    %c0_6 = arith.constant 0 : index
    %5 = vector.load %arg6[%c0_5, %c0_6] : memref<1x128xf32, #tpu.memory_space<vmem>>, vector<1x128xf32>
    %6 = vector.broadcast %5 : vector<1x128xf32> to vector<8x128xf32>
    %7 = arith.addf %4, %6 : vector<8x128xf32>
    %8 = math.tanh %7 : vector<8x128xf32>
    %9 = arith.truncf %8 : vector<8x128xf32> to vector<8x128xbf16>
    %c0_7 = arith.constant 0 : index
    %c0_8 = arith.constant 0 : index
    %10 = vector.load %arg7[%c0_7, %c0_8] : memref<128x16xbf16, #tpu.memory_space<vmem>>, vector<128x16xbf16>
    %cst_9 = arith.constant dense<0.000000e+00> : vector<8x16xf32>
    %11 = tpu.matmul %9, %10, %cst_9 {dimension_numbers = #tpu.dot_dimension_numbers<[1], [0], [0], [1], [0, 0, 1, 1], [], []>} : vector<8x128xbf16>, vector<128x16xbf16>, vector<8x16xf32> -> vector<8x16xf32>
    %c0_10 = arith.constant 0 : index
    %c0_11 = arith.constant 0 : index
    %12 = vector.load %arg8[%c0_10, %c0_11] : memref<1x16xf32, #tpu.memory_space<vmem>>, vector<1x16xf32>
    %13 = vector.broadcast %12 : vector<1x16xf32> to vector<8x16xf32>
    %14 = arith.addf %11, %13 : vector<8x16xf32>
    %c0_12 = arith.constant 0 : index
    %c0_13 = arith.constant 0 : index
    %15 = vector.load %arg9[%c0_12, %c0_13] : memref<128x16xbf16, #tpu.memory_space<vmem>>, vector<128x16xbf16>
    %cst_14 = arith.constant dense<0.000000e+00> : vector<8x16xf32>
    %16 = tpu.matmul %9, %15, %cst_14 {dimension_numbers = #tpu.dot_dimension_numbers<[1], [0], [0], [1], [0, 0, 1, 1], [], []>} : vector<8x128xbf16>, vector<128x16xbf16>, vector<8x16xf32> -> vector<8x16xf32>
    %c0_15 = arith.constant 0 : index
    %c0_16 = arith.constant 0 : index
    %17 = vector.load %arg10[%c0_15, %c0_16] : memref<1x16xf32, #tpu.memory_space<vmem>>, vector<1x16xf32>
    %18 = vector.broadcast %17 : vector<1x16xf32> to vector<8x16xf32>
    %19 = arith.addf %16, %18 : vector<8x16xf32>
    %cst_17 = arith.constant 0.000000e+00 : f32
    %20 = vector.broadcast %cst_17 : f32 to vector<8x16xf32>
    %21 = arith.maximumf %19, %20 : vector<8x16xf32>
    %22 = vector.broadcast %cst_17 : f32 to vector<8x16xf32>
    %23 = arith.subf %19, %22 : vector<8x16xf32>
    %24 = arith.cmpf one, %23, %23 : vector<8x16xf32>
    %25 = vector.broadcast %cst_17 : f32 to vector<8x16xf32>
    %26 = arith.addf %19, %25 : vector<8x16xf32>
    %27 = math.absf %23 : vector<8x16xf32>
    %cst_18 = arith.constant 0.000000e+00 : f32
    %28 = vector.broadcast %cst_18 : f32 to vector<8x16xf32>
    %29 = arith.subf %28, %27 : vector<8x16xf32>
    %30 = math.exp %29 : vector<8x16xf32>
    %31 = math.log1p %30 : vector<8x16xf32>
    %32 = arith.addf %21, %31 : vector<8x16xf32>
    %33 = arith.select %24, %26, %32 : vector<8x16xi1>, vector<8x16xf32>
    %34 = arith.mulf %33, %1 : vector<8x16xf32>
    %35 = arith.addf %34, %14 : vector<8x16xf32>
    %36 = arith.truncf %35 : vector<8x16xf32> to vector<8x16xbf16>
    %c0_19 = arith.constant 0 : index
    %c0_20 = arith.constant 0 : index
    %37 = vector.load %arg11[%c0_19, %c0_20] : memref<16x128xbf16, #tpu.memory_space<vmem>>, vector<16x128xbf16>
    %cst_21 = arith.constant dense<0.000000e+00> : vector<8x128xf32>
    %38 = tpu.matmul %36, %37, %cst_21 {dimension_numbers = #tpu.dot_dimension_numbers<[1], [0], [0], [1], [0, 0, 1, 1], [], []>} : vector<8x16xbf16>, vector<16x128xbf16>, vector<8x128xf32> -> vector<8x128xf32>
    %c0_22 = arith.constant 0 : index
    %c0_23 = arith.constant 0 : index
    %39 = vector.load %arg12[%c0_22, %c0_23] : memref<1x128xf32, #tpu.memory_space<vmem>>, vector<1x128xf32>
    %40 = vector.broadcast %39 : vector<1x128xf32> to vector<8x128xf32>
    %41 = arith.addf %38, %40 : vector<8x128xf32>
    %42 = math.tanh %41 : vector<8x128xf32>
    %43 = arith.truncf %42 : vector<8x128xf32> to vector<8x128xbf16>
    %c0_24 = arith.constant 0 : index
    %c0_25 = arith.constant 0 : index
    %44 = vector.load %arg13[%c0_24, %c0_25] : memref<128x784xbf16, #tpu.memory_space<vmem>>, vector<128x784xbf16>
    %cst_26 = arith.constant dense<0.000000e+00> : vector<8x784xf32>
    %45 = tpu.matmul %43, %44, %cst_26 {dimension_numbers = #tpu.dot_dimension_numbers<[1], [0], [0], [1], [0, 0, 1, 1], [], []>} : vector<8x128xbf16>, vector<128x784xbf16>, vector<8x784xf32> -> vector<8x784xf32>
    %c0_27 = arith.constant 0 : index
    %c0_28 = arith.constant 0 : index
    %46 = vector.load %arg14[%c0_27, %c0_28] : memref<1x784xf32, #tpu.memory_space<vmem>>, vector<1x784xf32>
    %47 = vector.broadcast %46 : vector<1x784xf32> to vector<8x784xf32>
    %48 = arith.addf %45, %47 : vector<8x784xf32>
    %cst_29 = arith.constant 0.000000e+00 : f32
    %49 = vector.broadcast %cst_29 : f32 to vector<8x784xf32>
    %50 = arith.maximumf %48, %49 : vector<8x784xf32>
    %51 = vector.broadcast %cst_29 : f32 to vector<8x784xf32>
    %52 = arith.subf %48, %51 : vector<8x784xf32>
    %53 = arith.cmpf one, %52, %52 : vector<8x784xf32>
    %54 = vector.broadcast %cst_29 : f32 to vector<8x784xf32>
    %55 = arith.addf %48, %54 : vector<8x784xf32>
    %56 = math.absf %52 : vector<8x784xf32>
    %cst_30 = arith.constant 0.000000e+00 : f32
    %57 = vector.broadcast %cst_30 : f32 to vector<8x784xf32>
    %58 = arith.subf %57, %56 : vector<8x784xf32>
    %59 = math.exp %58 : vector<8x784xf32>
    %60 = math.log1p %59 : vector<8x784xf32>
    %61 = arith.addf %50, %60 : vector<8x784xf32>
    %62 = arith.select %53, %55, %61 : vector<8x784xi1>, vector<8x784xf32>
    %63 = arith.mulf %0, %48 : vector<8x784xf32>
    %64 = arith.subf %62, %63 : vector<8x784xf32>
    %cst_31 = arith.constant dense<0.000000e+00> : vector<8xf32>
    %65 = vector.multi_reduction <add>, %64, %cst_31 [1] : vector<8x784xf32> to vector<8xf32>
    %66 = vector.shape_cast %65 : vector<8xf32> to vector<8x1xf32>
    %67 = math.log %33 : vector<8x16xf32>
    %cst_32 = arith.constant 2.000000e+00 : f32
    %68 = vector.broadcast %cst_32 : f32 to vector<8x16xf32>
    %69 = arith.mulf %68, %67 : vector<8x16xf32>
    %cst_33 = arith.constant 1.000000e+00 : f32
    %70 = vector.broadcast %cst_33 : f32 to vector<8x16xf32>
    %71 = arith.addf %70, %69 : vector<8x16xf32>
    %72 = arith.mulf %14, %14 : vector<8x16xf32>
    %73 = arith.subf %71, %72 : vector<8x16xf32>
    %74 = arith.mulf %33, %33 : vector<8x16xf32>
    %75 = arith.subf %73, %74 : vector<8x16xf32>
    %cst_34 = arith.constant dense<0.000000e+00> : vector<8xf32>
    %76 = vector.multi_reduction <add>, %75, %cst_34 [1] : vector<8x16xf32> to vector<8xf32>
    %77 = vector.shape_cast %76 : vector<8xf32> to vector<8x1xf32>
    %cst_35 = arith.constant -5.000000e-01 : f32
    %78 = vector.broadcast %cst_35 : f32 to vector<8x1xf32>
    %79 = arith.mulf %78, %77 : vector<8x1xf32>
    %c1_i32 = arith.constant 1 : i32
    %80 = arith.muli %arg0, %c1_i32 : i32
    %81 = arith.addi %80, %arg1 : i32
    %c8_i32 = arith.constant 8 : i32
    %82 = arith.muli %81, %c8_i32 : i32
    %83 = tpu.iota {dimensions = array<i32: 0>} : vector<8x1xi32>
    %84 = vector.broadcast %82 : i32 to vector<8x1xi32>
    %85 = arith.addi %84, %83 : vector<8x1xi32>
    %c0_36 = arith.constant 0 : index
    %86 = memref.load %arg2[%c0_36] : memref<1xi32, #tpu.memory_space<smem>>
    %87 = vector.broadcast %86 : i32 to vector<8x1xi32>
    %88 = arith.cmpi slt, %85, %87 : vector<8x1xi32>
    %89 = arith.extui %88 : vector<8x1xi1> to vector<8x1xi32>
    %90 = arith.sitofp %89 : vector<8x1xi32> to vector<8x1xf32>
    %91 = arith.addf %66, %79 : vector<8x1xf32>
    %92 = arith.mulf %91, %90 : vector<8x1xf32>
    %93 = vector.shape_cast %92 : vector<8x1xf32> to vector<1x8x1xf32>
    %cst_37 = arith.constant dense<0.000000e+00> : vector<1xf32>
    %94 = vector.multi_reduction <add>, %93, %cst_37 [1, 2] : vector<1x8x1xf32> to vector<1xf32>
    %95 = vector.shape_cast %94 : vector<1xf32> to vector<1x1x1xf32>
    %96 = vector.extract %95[0, 0, 0] : f32 from vector<1x1x1xf32>
    %c0_i32 = arith.constant 0 : i32
    %97 = arith.cmpi eq, %arg1, %c0_i32 : i32
    %98 = arith.extui %97 : i1 to i32
    %c0_i32_38 = arith.constant 0 : i32
    %99 = arith.cmpi ne, %98, %c0_i32_38 : i32
    scf.if %99 {
      %cst_45 = arith.constant 0.000000e+00 : f32
      %104 = vector.broadcast %cst_45 : f32 to vector<1x1x1xf32>
      %c0_46 = arith.constant 0 : index
      %c0_47 = arith.constant 0 : index
      %c0_48 = arith.constant 0 : index
      %105 = vector.load %arg15[%c0_46, %c0_47, %c0_48] : memref<1x1x1xf32, #tpu.memory_space<vmem>>, vector<1x1x1xf32>
      tpu.vector_store %arg15[%c0_46, %c0_47, %c0_48], %104 {strides = array<i32>} : memref<1x1x1xf32, #tpu.memory_space<vmem>>, vector<1x1x1xf32>,
    } else {
    }
    %c0_39 = arith.constant 0 : index
    %c0_40 = arith.constant 0 : index
    %c0_41 = arith.constant 0 : index
    %100 = vector.load %arg15[%c0_39, %c0_40, %c0_41] : memref<1x1x1xf32, #tpu.memory_space<vmem>>, vector<1x1x1xf32>
    %101 = vector.broadcast %96 : f32 to vector<1x1x1xf32>
    %102 = arith.addf %100, %101 : vector<1x1x1xf32>
    %c0_42 = arith.constant 0 : index
    %c0_43 = arith.constant 0 : index
    %c0_44 = arith.constant 0 : index
    %103 = vector.load %arg15[%c0_42, %c0_43, %c0_44] : memref<1x1x1xf32, #tpu.memory_space<vmem>>, vector<1x1x1xf32>
    tpu.vector_store %arg15[%c0_42, %c0_43, %c0_44], %102 {strides = array<i32>} : memref<1x1x1xf32, #tpu.memory_space<vmem>>, vector<1x1x1xf32>,
    return
  }
  func.func @transform_0(%arg0: i32, %arg1: i32) -> i32 {
    %c0_i32 = arith.constant 0 : i32
    %c0_i32_0 = arith.constant 0 : i32
    return %c0_i32 : i32
  }
  func.func @transform_1(%arg0: i32, %arg1: i32) -> (i32, i32) {
    %c1_i32 = arith.constant 1 : i32
    %0 = arith.muli %arg0, %c1_i32 : i32
    %1 = arith.addi %0, %arg1 : i32
    %c0_i32 = arith.constant 0 : i32
    %c0_i32_0 = arith.constant 0 : i32
    return %1, %c0_i32 : i32, i32
  }
  func.func @transform_2(%arg0: i32, %arg1: i32) -> (i32, i32) {
    %c1_i32 = arith.constant 1 : i32
    %0 = arith.muli %arg0, %c1_i32 : i32
    %1 = arith.addi %0, %arg1 : i32
    %c0_i32 = arith.constant 0 : i32
    %c0_i32_0 = arith.constant 0 : i32
    return %1, %c0_i32 : i32, i32
  }
  func.func @transform_3(%arg0: i32, %arg1: i32) -> (i32, i32) {
    %c0_i32 = arith.constant 0 : i32
    %c0_i32_0 = arith.constant 0 : i32
    %c0_i32_1 = arith.constant 0 : i32
    return %c0_i32, %c0_i32_0 : i32, i32
  }
  func.func @transform_4(%arg0: i32, %arg1: i32) -> (i32, i32) {
    %c0_i32 = arith.constant 0 : i32
    %c0_i32_0 = arith.constant 0 : i32
    %c0_i32_1 = arith.constant 0 : i32
    return %c0_i32, %c0_i32_0 : i32, i32
  }
  func.func @transform_5(%arg0: i32, %arg1: i32) -> (i32, i32) {
    %c0_i32 = arith.constant 0 : i32
    %c0_i32_0 = arith.constant 0 : i32
    %c0_i32_1 = arith.constant 0 : i32
    return %c0_i32, %c0_i32_0 : i32, i32
  }
  func.func @transform_6(%arg0: i32, %arg1: i32) -> (i32, i32) {
    %c0_i32 = arith.constant 0 : i32
    %c0_i32_0 = arith.constant 0 : i32
    %c0_i32_1 = arith.constant 0 : i32
    return %c0_i32, %c0_i32_0 : i32, i32
  }
  func.func @transform_7(%arg0: i32, %arg1: i32) -> (i32, i32) {
    %c0_i32 = arith.constant 0 : i32
    %c0_i32_0 = arith.constant 0 : i32
    %c0_i32_1 = arith.constant 0 : i32
    return %c0_i32, %c0_i32_0 : i32, i32
  }
  func.func @transform_8(%arg0: i32, %arg1: i32) -> (i32, i32) {
    %c0_i32 = arith.constant 0 : i32
    %c0_i32_0 = arith.constant 0 : i32
    %c0_i32_1 = arith.constant 0 : i32
    return %c0_i32, %c0_i32_0 : i32, i32
  }
  func.func @transform_9(%arg0: i32, %arg1: i32) -> (i32, i32) {
    %c0_i32 = arith.constant 0 : i32
    %c0_i32_0 = arith.constant 0 : i32
    %c0_i32_1 = arith.constant 0 : i32
    return %c0_i32, %c0_i32_0 : i32, i32
  }
  func.func @transform_10(%arg0: i32, %arg1: i32) -> (i32, i32) {
    %c0_i32 = arith.constant 0 : i32
    %c0_i32_0 = arith.constant 0 : i32
    %c0_i32_1 = arith.constant 0 : i32
    return %c0_i32, %c0_i32_0 : i32, i32
  }
  func.func @transform_11(%arg0: i32, %arg1: i32) -> (i32, i32) {
    %c0_i32 = arith.constant 0 : i32
    %c0_i32_0 = arith.constant 0 : i32
    %c0_i32_1 = arith.constant 0 : i32
    return %c0_i32, %c0_i32_0 : i32, i32
  }
  func.func @transform_12(%arg0: i32, %arg1: i32) -> (i32, i32) {
    %c0_i32 = arith.constant 0 : i32
    %c0_i32_0 = arith.constant 0 : i32
    %c0_i32_1 = arith.constant 0 : i32
    return %c0_i32, %c0_i32_0 : i32, i32
  }
  func.func @transform_13(%arg0: i32, %arg1: i32) -> (i32, i32, i32) {
    %c0_i32 = arith.constant 0 : i32
    %c0_i32_0 = arith.constant 0 : i32
    %c0_i32_1 = arith.constant 0 : i32
    return %arg0, %c0_i32, %c0_i32_0 : i32, i32, i32
  }
}

</mosaic_0001>

<bundles_post_ra>
// kernel: tpu_custom_call.1
= control target key start
LH: loop header
LB: loop body
LE: loop exit
PB: predicated region body
PF: predicated region fallthrough
CT: control target
= control target key end

     0   :  { %s2809_s27 = smov 0   ;;  %s2811_s28 = smov 0   ;;  %s3390_s0 = inlined_call_operand.<no memory space> [shape: s32[1], index: 0, kind: input, shape index: {}]   ;;  %s3391_s1 = inlined_call_operand.vmem [shape: f32[16,784], index: 1, kind: input, shape index: {}]   ;;  %s3392_s2 = inlined_call_operand.vmem [shape: f32[16,16], index: 2, kind: input, shape index: {}]   ;;  %s3393_s3 = inlined_call_operand.vmem [shape: bf16[784,128], index: 3, kind: input, shape index: {}]   ;;  %s3394_s4 = inlined_call_operand.vmem [shape: f32[1,128], index: 4, kind: input, shape index: {}]   ;;  %s3395_s5 = inlined_call_operand.vmem [shape: bf16[128,16], index: 5, kind: input, shape index: {}]   ;;  %s3396_s6 = inlined_call_operand.vmem [shape: f32[1,16], index: 6, kind: input, shape index: {}]   ;;  %s3397_s7 = inlined_call_operand.vmem [shape: bf16[128,16], index: 7, kind: input, shape index: {}]   ;;  %s3398_s8 = inlined_call_operand.vmem [shape: f32[1,16], index: 8, kind: input, shape index: {}]   ;;  %s3399_s9 = inlined_call_operand.vmem [shape: bf16[16,128], index: 9, kind: input, shape index: {}]   ;;  %s3400_s10 = inlined_call_operand.vmem [shape: f32[1,128], index: 10, kind: input, shape index: {}]   ;;  %s3401_s11 = inlined_call_operand.vmem [shape: bf16[128,784], index: 11, kind: input, shape index: {}]   ;;  %s3402_s12 = inlined_call_operand.vmem [shape: f32[1,784], index: 12, kind: input, shape index: {}]   ;;  %s3403_s13 = inlined_call_operand.vmem [shape: f32[2,1,1], index: 13, kind: output, shape index: {}]  }
   0x1   :  { %18 = sst [smem:[#allocation2]] %s3390_s0  ;;  %s2813_s29 = smov 0  }
   0x2 LB: > { %s36_s0 = sadd.s32 1, %s2727_s28  ;;  %p2184_p0 = scmp.ge.s32.totalorder %s2731_s29, 1  ;;  %s2731_s29 = sphi %s2813_s29, %s24_s29   ;;  %s2727_s28 = sphi %s2811_s28, %s3411_s28   ;;  %s2723_s27 = sphi %s2809_s27, %s3410_s27  }
   0x3   : > { %p38_p1 = scmp.ge.s32.totalorder %s36_s0, 2  ;;  %p417_p2 = scmp.lt.s32.totalorder %s2731_s29, 3 }
   0x5   : > { %s3413_s0 = smov (%p38_p1, %s36_s0), 0  ;;  %p418_p3 = pnand %p2184_p0, %p417_p2 }
   0x6   : > { %v2518_v0 = vld [vmem:[%s3393_s3 + $0x40] sm:$0xff] (!%p418_p3)   ;;  %v2522_v4 = vld [vmem:[%s3393_s3 + $0x48] sm:$0xff] (!%p418_p3)   ;;  %v2526_v8 = vld [vmem:[%s3393_s3 + $0x50] sm:$0xff] (!%p418_p3)   ;;  %p466_p4 = scmp.lt.s32.totalorder (!%p418_p3), %s2723_s27, 1  ;;  %v2733_v44 = vmov (!%p418_p3), 0.0   ;;  %vm2734_vm0 = vmmov (!%p418_p3), 0  }
   0x7   : > { %421 = sbr.rel (%p418_p3) target bundleno = 1431 (0x597), region = 72  ;;  %v2519_v1 = vld [vmem:[%s3393_s3] sm:$0xff] (!%p418_p3)   ;;  %2319 = vmatprep.subr.bf16.mxu0 (!%p418_p3), %v2518_v0  ;;  %v2523_v5 = vld [vmem:[%s3393_s3 + $0x8] sm:$0xff] (!%p418_p3)   ;;  %v2527_v9 = vld [vmem:[%s3393_s3 + $0x10] sm:$0xff] (!%p418_p3)   ;;  %vm896_vm1 = vcmask (!%p418_p3), 130048   ;;  %s2084_s16 = sld [smem:[#allocation2]] (!%p418_p3) }
   0x8   : > { %v2520_v2 = vld [vmem:[%s3393_s3 + $0xc0] sm:$0xff] (!%p418_p3)   ;;  %2320 = vmatpush3.bf16.msra.mxu0 (!%p418_p3), %v2519_v1  ;;  %v2524_v6 = vld [vmem:[%s3393_s3 + $0xc8] sm:$0xff] (!%p418_p3)   ;;  %v2528_v10 = vld [vmem:[%s3393_s3 + $0xd0] sm:$0xff] (!%p418_p3)  }
   0x9   : > { %v2521_v3 = vld [vmem:[%s3393_s3 + $0x80] sm:$0xff] (!%p418_p3)   ;;  %2341 = vmatprep.subr.bf16.mxu1 (!%p418_p3), %v2520_v2  ;;  %2321 = vmatprep.subr.bf16.mxu0 (!%p418_p3), %v2522_v4  ;;  %v2525_v7 = vld [vmem:[%s3393_s3 + $0x88] sm:$0xff] (!%p418_p3)   ;;  %v2529_v11 = vld [vmem:[%s3393_s3 + $0x90] sm:$0xff] (!%p418_p3)  }
   0xa   : > { %2342 = vmatpush3.bf16.msra.mxu1 (!%p418_p3), %v2521_v3  ;;  %v2530_v12 = vld [vmem:[%s3393_s3 + $0x58] sm:$0xff] (!%p418_p3)   ;;  %v2534_v16 = vld [vmem:[%s3393_s3 + $0x60] sm:$0xff] (!%p418_p3)   ;;  %v2538_v20 = vld [vmem:[%s3393_s3 + $0x68] sm:$0xff] (!%p418_p3)  }
   0xb   : > { %2343 = vmatprep.subr.bf16.mxu1 (!%p418_p3), %v2524_v6  ;;  %v2531_v13 = vld [vmem:[%s3393_s3 + $0x18] sm:$0xff] (!%p418_p3)   ;;  %v2535_v17 = vld [vmem:[%s3393_s3 + $0x20] sm:$0xff] (!%p418_p3)   ;;  %v2539_v21 = vld [vmem:[%s3393_s3 + $0x28] sm:$0xff] (!%p418_p3)  }
   0xc   : > { %2322 = vmatpush3.bf16.msra.mxu0 (!%p418_p3), %v2523_v5  ;;  %v2532_v14 = vld [vmem:[%s3393_s3 + $0xd8] sm:$0xff] (!%p418_p3)   ;;  %v2536_v18 = vld [vmem:[%s3393_s3 + $0xe0] sm:$0xff] (!%p418_p3)   ;;  %v2540_v22 = vld [vmem:[%s3393_s3 + $0xe8] sm:$0xff] (!%p418_p3)  }
   0xd   : > { %2323 = vmatprep.subr.bf16.mxu0 (!%p418_p3), %v2526_v8  ;;  %v2533_v15 = vld [vmem:[%s3393_s3 + $0x98] sm:$0xff] (!%p418_p3)   ;;  %v2537_v19 = vld [vmem:[%s3393_s3 + $0xa0] sm:$0xff] (!%p418_p3)   ;;  %v2541_v23 = vld [vmem:[%s3393_s3 + $0xa8] sm:$0xff] (!%p418_p3)  }
   0xe   : > { %2344 = vmatpush3.bf16.msra.mxu1 %v2525_v7  ;;  %s2894_s30 = scalar_select %p466_p4, %s2723_s27, 1  ;;  %v2542_v24 = vld [vmem:[%s3393_s3 + $0x70] sm:$0xff]   ;;  %v2546_v28 = vld [vmem:[%s3393_s3 + $0x78] sm:$0xff]   ;;  %v2550_v36 = vld [vmem:[%s3393_s3 + $0x140] sm:$0xff]  }
   0xf   : > { %2345 = vmatprep.subr.bf16.mxu1 %v2528_v10  ;;  %v2543_v25 = vld [vmem:[%s3393_s3 + $0x30] sm:$0xff]   ;;  %v2547_v29 = vld [vmem:[%s3393_s3 + $0x38] sm:$0xff]   ;;  %v2551_v39 = vld [vmem:[%s3393_s3 + $0x100] sm:$0xff]  }
  0x10   : > { %2324 = vmatpush3.bf16.msra.mxu0 %v2527_v9  ;;  %s2488_s22 = smul.u32 56, %s2894_s30  ;;  %v2544_v26 = vld [vmem:[%s3393_s3 + $0xf0] sm:$0xff]   ;;  %v2548_v30 = vld [vmem:[%s3393_s3 + $0xf8] sm:$0xff]   ;;  %v2552_v42 = vld [vmem:[%s3393_s3 + $0x148] sm:$0xff]   ;;  %s2186_s14 = sshll.u32 %s2894_s30, 3 }
  0x11   : > { %2325 = vmatprep.subr.bf16.mxu0 %v2530_v12  ;;  %v2545_v27 = vld [vmem:[%s3393_s3 + $0xb0] sm:$0xff]   ;;  %v2549_v33 = vld [vmem:[%s3393_s3 + $0xb8] sm:$0xff]   ;;  %v2553_v43 = vld [vmem:[%s3393_s3 + $0x108] sm:$0xff]   ;;  %s476_s17 = scalar_lea.vmem %s3392_s2, %s2186_s14  ;;  %s480_s19 = scalar_lea.vmem %s3403_s13, %s2894_s30 }
  0x12   : > { %2346 = vmatpush3.bf16.msra.mxu1 %v2529_v11  ;;  %s2924_s20 = scalar_lea.vmem %s3391_s1, %s2488_s22  ;;  %v2554_v45 = vld [vmem:[%s3393_s3 + $0x150] sm:$0xff]   ;;  %v2556_v47 = vld [vmem:[%s3393_s3 + $0x158] sm:$0xff]   ;;  %v2558_v49 = vld [vmem:[%s3393_s3 + $0x160] sm:$0xff]  }
  0x13   : > { %2347 = vmatprep.subr.bf16.mxu1 %v2532_v14  ;;  %v483_v31 = vld [vmem:[%s2924_s20 + $0x8] sm:$0xff]  ;;  %v482_v34 = vld [vmem:[%s2924_s20] sm:$0xff]  ;;  %v485_v37 = vld [vmem:[%s2924_s20 + $0x18] sm:$0xff] }
  0x14   : > { %2326 = vmatpush3.bf16.msra.mxu0 %v2531_v13  ;;  %v491_v32 = vpack.c.bf16 %v483_v31, %v483_v31  ;;  %v490_v35 = vpack.c.bf16 %v482_v34, %v482_v34  ;;  %v493_v38 = vpack.c.bf16 %v485_v37, %v485_v37  ;;  %v484_v40 = vld [vmem:[%s2924_s20 + $0x10] sm:$0xff]  ;;  %v2557_v48 = vld [vmem:[%s3393_s3 + $0x118] sm:$0xff]   ;;  %v2559_v50 = vld [vmem:[%s3393_s3 + $0x120] sm:$0xff]  }
  0x15   : > { %2327 = vmatprep.subr.bf16.mxu0 %v2534_v16  ;;  %v492_v41 = vpack.c.bf16 %v484_v40, %v484_v40  ;;  %v2555_v46 = vld [vmem:[%s3393_s3 + $0x110] sm:$0xff]   ;;  %v2560_v51 = vld [vmem:[%s3393_s3 + $0x168] sm:$0xff]   ;;  %v2566_v53 = vld [vmem:[%s3393_s3 + $0x180] sm:$0xff]  }
  0x16   : > { %2348 = vmatpush3.bf16.msra.mxu1 %v2533_v15  ;;  %932 = vmatprep.mubr.bf16.mxu0 %v491_v32  ;;  %v2561_v52 = vld [vmem:[%s3393_s3 + $0x128] sm:$0xff]   ;;  %v2562_v55 = vld [vmem:[%s3393_s3 + $0x170] sm:$0xff]   ;;  %v2564_v60 = vld [vmem:[%s3393_s3 + $0x178] sm:$0xff]  }
  0x17   : > { %2349 = vmatprep.subr.bf16.mxu1 %v2536_v18  ;;  %972 = vmatprep.mubr.bf16.mxu1 %v493_v38  ;;  %v487_v54 = vld [vmem:[%s2924_s20 + $0x28] sm:$0xff]  ;;  %v488_v57 = vld [vmem:[%s2924_s20 + $0x30] sm:$0xff]  ;;  %v2565_v61 = vld [vmem:[%s3393_s3 + $0x138] sm:$0xff]  }
  0x18   : > { %2328 = vmatpush3.bf16.msra.mxu0 %v2535_v17  ;;  %v495_v56 = vpack.c.bf16 %v487_v54, %v487_v54  ;;  %v496_v58 = vpack.c.bf16 %v488_v57, %v488_v57  ;;  %v2563_v59 = vld [vmem:[%s3393_s3 + $0x130] sm:$0xff]   ;;  %v486_v62 = vld [vmem:[%s2924_s20 + $0x20] sm:$0xff]  ;;  %v2569_v2 = vld [vmem:[%s3395_s5 + $0x8] sm:$0xff]  }
  0x19   : > { %2329 = vmatprep.subr.bf16.mxu0 %v2538_v20  ;;  %v494_v63 = vpack.c.bf16 %v486_v62, %v486_v62  ;;  %v2567_v0 = vld [vmem:[%s3395_s5] sm:$0xff]   ;;  %v2570_v3 = vld [vmem:[%s3397_s7 + $0x8] sm:$0xff]   ;;  %v2571_v4 = vld [vmem:[%s3395_s5 + $0x10] sm:$0xff]  }
  0x1a   : > { %2350 = vmatpush3.bf16.msra.mxu1 %v2537_v19  ;;  %v2568_v1 = vld [vmem:[%s3397_s7] sm:$0xff]   ;;  %v2572_v5 = vld [vmem:[%s3397_s7 + $0x10] sm:$0xff]   ;;  %v2573_v6 = vld [vmem:[%s3395_s5 + $0x18] sm:$0xff]  }
  0x1b   : > { %2351 = vmatprep.subr.bf16.mxu1 %v2540_v22  ;;  %v2574_v7 = vld [vmem:[%s3397_s7 + $0x18] sm:$0xff]   ;;  %v2575_v8 = vld [vmem:[%s3395_s5 + $0x20] sm:$0xff]   ;;  %v2577_v10 = vld [vmem:[%s3395_s5 + $0x28] sm:$0xff]  }
  0x1c   : > { %2330 = vmatpush3.bf16.msra.mxu0 %v2539_v21  ;;  %v2576_v9 = vld [vmem:[%s3397_s7 + $0x20] sm:$0xff]   ;;  %v2578_v11 = vld [vmem:[%s3397_s7 + $0x28] sm:$0xff]   ;;  %v2579_v12 = vld [vmem:[%s3395_s5 + $0x30] sm:$0xff]  }
  0x1d   : > { %2331 = vmatprep.subr.bf16.mxu0 %v2542_v24  ;;  %v2580_v13 = vld [vmem:[%s3397_s7 + $0x30] sm:$0xff]   ;;  %v2581_v14 = vld [vmem:[%s3395_s5 + $0x38] sm:$0xff]   ;;  %v2187_v17 = vld [vmem:[%s3394_s4] ss:$0 sm:$0xff] }
  0x1e   : > { %2352 = vmatpush3.bf16.msra.mxu1 %v2541_v23  ;;  %v2582_v15 = vld [vmem:[%s3397_s7 + $0x38] sm:$0xff]  }
  0x1f   : > { %2353 = vmatprep.subr.bf16.mxu1 %v2544_v26 }
  0x20   : > { %2332 = vmatpush3.bf16.msra.mxu0 %v2543_v25 }
  0x21   : > { %2333 = vmatprep.subr.bf16.mxu0 %v2546_v28 }
  0x22   : > { %2354 = vmatpush3.bf16.msra.mxu1 %v2545_v27 }
  0x23   : > { %2355 = vmatprep.subr.bf16.mxu1 %v2548_v30 }
  0x24   : > { %2334 = vmatpush3.bf16.msra.mxu0 %v2547_v29 }
  0x25   : > { %2363 = vmatprep.subr.bf16.mxu0 %v2550_v36 }
  0x26   : > { %2356 = vmatpush3.bf16.msra.mxu1 %v2549_v33 }
  0x27   : > { %933 = vmatmul.mubr.bf16.vlgmr.msra.gmra.mrb[0].mxu0 %v490_v35  ;;  %2416 = vmatprep.subr.bf16.mxu1 %v2733_v44 }
  0x28   : > { %2364 = vmatpush3.bf16.msra.mxu0 %v2551_v39  ;;  %1012 = vmatprep.mubr.bf16.mxu0 %v495_v56 }
  0x29   : > { %973 = vmatmul.mubr.bf16.vlgmr.msra.gmra.mrb[0].mxu1 %v492_v41  ;;  %2365 = vmatprep.subr.bf16.mxu0 %v2552_v42  ;;  %v2583_v42 = vld [vmem:[%s3399_s9] sm:$0xff]  }
  0x2a   : > { %2418 = vmatprep.mubr.msk.bf16.mxu1 %vm2734_vm0, %v2733_v44  ;;  %2417 = vmatpush3.bf16.msra.mxu1 %v2566_v53 }
  0x2b   : > { %2422 = vmatprep.subr.bf16.mxu1 %v2733_v44 }
  0x2c   : > { %2366 = vmatpush3.bf16.msra.mxu0 %v2553_v43  ;;  %v2247_v43 = vld [vmem:[%s3398_s8] ss:$0 sm:$0xff] }
  0x2d   : > { %2367 = vmatprep.subr.bf16.mxu0 %v2554_v45 }
  0x30   : > { %2368 = vmatpush3.bf16.msra.mxu0 %v2555_v46 }
  0x31   : > { %2369 = vmatprep.subr.bf16.mxu0 %v2556_v47  ;;  %2419 = vmatmul.mubr.msk.bf16.vlgmr.msra.gmra.mrb[4].mxu1 %vm896_vm1, %v496_v58 }
  0x32   : > { %2438 = vmatprep.mubr.msk.bf16.mxu1 %vm2734_vm0, %v2733_v44  ;;  %2423 = vmatpush3.bf16.msra.mxu1 %v2567_v0 }
  0x33   : > { %2424 = vmatprep.subr.bf16.mxu1 %v2733_v44 }
  0x34   : > { %2370 = vmatpush3.bf16.msra.mxu0 %v2557_v48 }
  0x35   : > { %2371 = vmatprep.subr.bf16.mxu0 %v2558_v49 }
  0x36   : > { %2425 = vmatpush3.bf16.msra.mxu1 %v2569_v2 }
  0x37   : > { %2426 = vmatprep.subr.bf16.mxu1 %v2733_v44 }
  0x38   : > { %2372 = vmatpush3.bf16.msra.mxu0 %v2559_v50 }
  0x39   : > { %2373 = vmatprep.subr.bf16.mxu0 %v2560_v51 }
  0x3a   : > { %2427 = vmatpush3.bf16.msra.mxu1 %v2571_v4  ;;  %v489_v4 = vld [vmem:[%s476_s17] sm:$0xff]  ;;  %s2315_s17 = sshll.u32 %s2723_s27, 3 }
  0x3b   : > { %2428 = vmatprep.subr.bf16.mxu1 %v2733_v44 }
  0x3c   : > { %2374 = vmatpush3.bf16.msra.mxu0 %v2561_v52 }
  0x3d   : > { %2375 = vmatprep.subr.bf16.mxu0 %v2562_v55 }
  0x3e   : > { %2429 = vmatpush3.bf16.msra.mxu1 %v2573_v6 }
  0x3f   : > { %2430 = vmatprep.subr.bf16.mxu1 %v2733_v44 }
  0x40   : > { %2376 = vmatpush3.bf16.msra.mxu0 %v2563_v59 }
  0x41   : > { %2377 = vmatprep.subr.bf16.mxu0 %v2564_v60 }
  0x42   : > { %2431 = vmatpush3.bf16.msra.mxu1 %v2575_v8 }
  0x43   : > { %2432 = vmatprep.subr.bf16.mxu1 %v2733_v44 }
  0x44   : > { %2378 = vmatpush3.bf16.msra.mxu0 %v2565_v61 }
  0x45   : > { %2442 = vmatprep.subr.bf16.mxu0 %v2733_v44 }
  0x46   : > { %2433 = vmatpush3.bf16.msra.mxu1 %v2577_v10 }
  0x47   : > { %1013 = vmatmul.mubr.bf16.vlgmr.msra.gmra.mrb[4].mxu0 %v494_v63  ;;  %2434 = vmatprep.subr.bf16.mxu1 %v2733_v44 }
  0x48   : > { %2458 = vmatprep.mubr.msk.bf16.mxu0 %vm2734_vm0, %v2733_v44  ;;  %2443 = vmatpush3.bf16.msra.mxu0 %v2568_v1 }
  0x49   : > { %2444 = vmatprep.subr.bf16.mxu0 %v2733_v44 }
  0x4a   : > { %2435 = vmatpush3.bf16.msra.mxu1 %v2579_v12 }
  0x4b   : > { %2436 = vmatprep.subr.bf16.mxu1 %v2733_v44 }
  0x4c   : > { %2445 = vmatpush3.bf16.msra.mxu0 %v2570_v3  ;;  %v2238_v3 = vld [vmem:[%s3396_s6] ss:$0 sm:$0xff] }
  0x4d   : > { %2446 = vmatprep.subr.bf16.mxu0 %v2733_v44 }
  0x4e   : > { %2437 = vmatpush3.bf16.msra.mxu1 %v2581_v14 }
  0x4f   : > { %2462 = vmatprep.subr.bf16.mxu1 %v2733_v44 }
  0x50   : > { %2447 = vmatpush3.bf16.msra.mxu0 %v2572_v5 }
  0x51   : > { %2448 = vmatprep.subr.bf16.mxu0 %v2733_v44 }
  0x54   : > { %2449 = vmatpush3.bf16.msra.mxu0 %v2574_v7 }
  0x55   : > { %2450 = vmatprep.subr.bf16.mxu0 %v2733_v44 }
  0x58   : > { %2451 = vmatpush3.bf16.msra.mxu0 %v2576_v9 }
  0x59   : > { %2452 = vmatprep.subr.bf16.mxu0 %v2733_v44 }
  0x5c   : > { %2453 = vmatpush3.bf16.msra.mxu0 %v2578_v11 }
  0x5d   : > { %2454 = vmatprep.subr.bf16.mxu0 %v2733_v44 }
  0x60   : > { %2455 = vmatpush3.bf16.msra.mxu0 %v2580_v13 }
  0x61   : > { %2456 = vmatprep.subr.bf16.mxu0 %v2733_v44 }
  0x64   : > { %2457 = vmatpush3.bf16.msra.mxu0 %v2582_v15 }
  0xfa   : > { %v2335_v16 = vpop.f32.mrb[0].mxu0 }
  0xfb   : > { %v2336_v18 = vpop.f32.mrb[1].mxu0 }
  0xfc   : > { %v2337_v19 = vadd.f32 %v2336_v18, %v2335_v16  ;;  %v2338_v20 = vpop.f32.mrb[2].mxu0  ;;  %v2357_v21 = vpop.f32.mrb[0].mxu1 }
  0xfd   : > { %v2339_v22 = vpop.f32.mrb[3].mxu0  ;;  %v2358_v24 = vpop.f32.mrb[1].mxu1  ;;  %v2584_v20 = vld [vmem:[%s3401_s11] ss:$28 sps:$4 sm:$0xff]  }
  0xfe   : > { %v935_v23 = vadd.f32 %v2337_v19, %v2187_v17  ;;  %v2359_v25 = vadd.f32 %v2358_v24, %v2357_v21  ;;  %v2360_v26 = vpop.f32.mrb[2].mxu1  ;;  %v2586_v21 = vld [vmem:[%s3401_s11 + $0x4] ss:$28 sps:$4 sm:$0xff]   ;;  %v2592_v24 = vld [vmem:[%s3401_s11 + $0x3c] ss:$28 sps:$4 sm:$0xff]  }
  0xff   : > { %v2361_v27 = vpop.f32.mrb[3].mxu1  ;;  %v2587_v22 = vld [vmem:[%s3401_s11 + $0x8] ss:$28 sps:$4 sm:$0xff]   ;;  %v2590_v26 = vld [vmem:[%s3401_s11 + $0x38] ss:$28 sps:$4 sm:$0xff]  }
 0x100   : > { %v975_v28 = vadd.f32 %v2359_v25, %v935_v23  ;;  %v2589_v23 = vld [vmem:[%s3401_s11 + $0xc] ss:$28 sps:$4 sm:$0xff]   ;;  %v2595_v25 = vld [vmem:[%s3401_s11 + $0x44] ss:$28 sps:$4 sm:$0xff]  }
 0x101   : > { %1795 = vmatprep.subr.bf16.mxu0 %v2589_v23  ;;  %v2593_v27 = vld [vmem:[%s3401_s11 + $0x40] ss:$28 sps:$4 sm:$0xff]  }
 0x104   : > { %v1054_v29 = vpop.f32.mrb[4].mxu1 }
 0x105   : > { %v2420_v30 = vpop.f32.mrb[5].mxu1 }
 0x106   : > { %v1057_v31 = vpop.f32.mrb[6].mxu1  ;;  %v2596_v30 = vld [vmem:[%s3401_s11 + $0x70] ss:$28 sps:$4 sm:$0xff]  }
 0x107   : > { %v2421_v32 = vpop.f32.mrb[7].mxu1  ;;  %v2599_v31 = vld [vmem:[%s3401_s11 + $0x78] ss:$28 sps:$4 sm:$0xff]  }
 0x108   : > { %v2604_v32 = vld [vmem:[%s3401_s11 + $0xac] ss:$28 sps:$4 sm:$0xff]  }
 0x11a   : > { %v2379_v33 = vpop.f32.mrb[4].mxu0 }
 0x11b   : > { %v2380_v34 = vpop.f32.mrb[5].mxu0 }
 0x11c   : > { %v2381_v35 = vadd.f32 %v2380_v34, %v2379_v33  ;;  %v2382_v36 = vpop.f32.mrb[6].mxu0  ;;  %v2607_v33 = vld [vmem:[%s3401_s11 + $0xb4] ss:$28 sps:$4 sm:$0xff]   ;;  %v2602_v34 = vld [vmem:[%s3401_s11 + $0xa8] ss:$28 sps:$4 sm:$0xff]  }
 0x11d   : > { %v2383_v37 = vpop.f32.mrb[7].mxu0  ;;  %v2610_v36 = vld [vmem:[%s3401_s11 + $0xe4] ss:$28 sps:$4 sm:$0xff]  }
 0x11e   : > { %v1015_v38 = vadd.f32 %v2381_v35, %v975_v28  ;;  %v2598_v28 = vld [vmem:[%s3401_s11 + $0x74] ss:$28 sps:$4 sm:$0xff]   ;;  %v2613_v37 = vld [vmem:[%s3401_s11 + $0xec] ss:$28 sps:$4 sm:$0xff]  }
 0x11f   : > { %v2605_v35 = vld [vmem:[%s3401_s11 + $0xb0] ss:$28 sps:$4 sm:$0xff]  }
 0x120   : > { %v1055_v39 = vadd.f32 %v1054_v29, %v1015_v38  ;;  %v2601_v29 = vld [vmem:[%s3401_s11 + $0x7c] ss:$28 sps:$4 sm:$0xff]  }
 0x121   : > { %v2608_v38 = vld [vmem:[%s3401_s11 + $0xe0] ss:$28 sps:$4 sm:$0xff]  }
 0x122   : > { %2664 = vtanh.f32 %v1055_v39  ;;  %v2611_v39 = vld [vmem:[%s3401_s11 + $0xe8] ss:$28 sps:$4 sm:$0xff]  }
 0x12c   : > { %v2665_v40 = vpop.eup %2664 }
 0x12d   : > { %v1061_v41 = vpack.c.bf16 %v2665_v40, %v2665_v40  ;;  %v2616_v40 = vld [vmem:[%s3401_s11 + $0x11c] ss:$28 sps:$4 sm:$0xff]  }
 0x12f   : > { %2439 = vmatmul.mubr.bf16.vlgmr.msra.gmra.mrb[8].mxu1 %v1061_v41  ;;  %2459 = vmatmul.mubr.bf16.vlgmr.msra.gmra.mrb[8].mxu0 %v1061_v41  ;;  %v2619_v41 = vld [vmem:[%s3401_s11 + $0x124] ss:$28 sps:$4 sm:$0xff]  }
 0x130   : > { %2464 = vmatprep.mubr.msk.bf16.mxu1 %vm2734_vm0, %v2733_v44  ;;  %2463 = vmatpush3.bf16.msra.mxu1 %v2583_v42  ;;  %v2614_v42 = vld [vmem:[%s3401_s11 + $0x118] ss:$28 sps:$4 sm:$0xff]  }
 0x131   : > { %1754 = vmatprep.subr.bf16.mxu1 %v2586_v21  ;;  %1796 = vmatpush1.bf16.msra.mxu0 %v2587_v22  ;;  %v2663_v21 = vld [vmem:[%s3401_s11 + $0x1a0] ss:$28 sps:$4 sm:$0xff]   ;;  %v1431_v22 = vlaneseq }
 0x132   : > { %1797 = vmatprep.subr.bf16.mxu0 %v2595_v25 }
 0x133   : > { %v3267_v23 = vshrl.u32 %v1431_v22, 7 }
 0x135   : > { %1798 = vmatpush1.bf16.msra.mxu0 %v2593_v27  ;;  %v1441_v25 = vsub.s32 2, %v3267_v23  ;;  %v1437_v27 = vsub.s32 1, %v3267_v23 }
 0x136   : > { %1799 = vmatprep.subr.bf16.mxu0 %v2601_v29 }
 0x139   : > { %1800 = vmatpush1.bf16.msra.mxu0 %v2599_v31 }
 0x13a   : > { %1801 = vmatprep.subr.bf16.mxu0 %v2607_v33 }
 0x13d   : > { %1802 = vmatpush1.bf16.msra.mxu0 %v2605_v35 }
 0x13e   : > { %1803 = vmatprep.subr.bf16.mxu0 %v2613_v37 }
 0x141   : > { %1804 = vmatpush1.bf16.msra.mxu0 %v2611_v39 }
 0x142   : > { %1805 = vmatprep.subr.bf16.mxu0 %v2619_v41 }
 0x202   : > { %v1167_v45 = vpop.f32.mrb[8].mxu1  ;;  %v1278_v46 = vpop.f32.mrb[8].mxu0 }
 0x203   : > { %v1279_v47 = vadd.f32 %v2247_v43, %v1278_v46  ;;  %v2440_v48 = vpop.f32.mrb[9].mxu1  ;;  %v2460_v49 = vpop.f32.mrb[9].mxu0  ;;  %v1168_v7 = vadd.f32 %v2238_v3, %v1167_v45  ;;  %v2617_v43 = vld [vmem:[%s3401_s11 + $0x120] ss:$28 sps:$4 sm:$0xff]   ;;  %v2622_v45 = vld [vmem:[%s3401_s11 + $0x154] ss:$28 sps:$4 sm:$0xff]  }
 0x204   : > { %v1170_v50 = vpop.f32.mrb[10].mxu1  ;;  %v1281_v51 = vpop.f32.mrb[10].mxu0  ;;  %1806 = vmatpush1.bf16.msra.mxu0 %v2617_v43  ;;  %v2625_v46 = vld [vmem:[%s3401_s11 + $0x15c] ss:$28 sps:$4 sm:$0xff]   ;;  %v2628_v49 = vld [vmem:[%s3401_s11 + $0x18c] ss:$28 sps:$4 sm:$0xff]  }
 0x205   : > { %v1287_v52 = vand.u32 2147483647, %v1279_v47  ;;  %v2441_v53 = vpop.f32.mrb[11].mxu1  ;;  %v2461_v54 = vpop.f32.mrb[11].mxu0  ;;  %v1284_v1 = vmax.f32 %v1279_v47, 0.0  ;;  %vm1285_vm3 = vcmp.ne.f32.partialorder %v1279_v47, %v1279_v47  ;;  %v2070_v14 = vmul.f32 %v1168_v7, %v1168_v7  ;;  %1807 = vmatprep.subr.bf16.mxu0 %v2625_v46 }
 0x206   : > { %v2623_v48 = vld [vmem:[%s3401_s11 + $0x158] ss:$28 sps:$4 sm:$0xff]   ;;  %v2626_v51 = vld [vmem:[%s3401_s11 + $0x188] ss:$28 sps:$4 sm:$0xff]   ;;  %v2735_v54 = vmov 0  }
 0x207   : > { %v1288_v55 = vsub.f32 0.0, %v1287_v52  ;;  %v2631_v50 = vld [vmem:[%s3401_s11 + $0x194] ss:$28 sps:$4 sm:$0xff]   ;;  %1827 = vmatprep.mubr.bf16.mxu0 %v2735_v54 }
 0x208   : > { %1808 = vmatpush1.bf16.msra.mxu0 %v2623_v48  ;;  %v2629_v52 = vld [vmem:[%s3401_s11 + $0x190] ss:$28 sps:$4 sm:$0xff]  }
 0x209   : > { %v1289_v56 = vmul.f32 1.442695, %v1288_v55  ;;  %1809 = vmatprep.subr.bf16.mxu0 %v2631_v50  ;;  %v2634_v53 = vld [vmem:[%s3401_s11 + $0x14] ss:$28 sps:$4 sm:$0xff]   ;;  %v2256_v55 = vld [vmem:[%s3400_s10] ss:$0 sm:$0xff] }
 0x20a   : > { %v2639_v3 = vld [vmem:[%s3401_s11 + $0x50] ss:$28 sps:$4 sm:$0xff]  }
 0x20b   : > { %2666 = vpow2.f32 %v1289_v56 }
 0x20c   : > { %1810 = vmatpush1.bf16.msra.mxu0 %v2629_v52 }
 0x20d   : > { %2468 = vmatprep.subr.bf16.mxu0 %v2733_v44 }
 0x215   : > { %v2667_v57 = vpop.eup %2666 }
 0x216   : > { %v1291_v58 = vadd.f32 1.0, %v2667_v57  ;;  %v1294_v59 = vmul.f32 -0.5, %v2667_v57  ;;  %v1297_v61 = vand.u32 2147483647, %v2667_v57 }
 0x218   : > { %2668 = vlog2.f32 %v1291_v58  ;;  %v1295_v60 = vadd.f32 1.0, %v1294_v59  ;;  %vm1298_vm2 = vcmp.lt.f32.partialorder %v1297_v61, 0.0004427343 }
 0x21a   : > { %v1296_v0 = vmul.f32 %v2667_v57, %v1295_v60 }
 0x222   : > { %v2669_v62 = vpop.eup %2668 }
 0x223   : > { %v1293_v63 = vmul.f32 0.6931472, %v2669_v62  ;;  %v2632_v62 = vld [vmem:[%s3401_s11 + $0x10] ss:$28 sps:$4 sm:$0xff]  }
 0x225   : > { %v1299_v2 = vsel %vm1298_vm2, %v1296_v0, %v1293_v63  ;;  %v2635_v63 = vld [vmem:[%s3401_s11 + $0x18] ss:$28 sps:$4 sm:$0xff]  }
 0x226   : > { %v1300_v5 = vadd.f32 %v1299_v2, %v1284_v1  ;;  %v2638_v1 = vld [vmem:[%s3401_s11 + $0x4c] ss:$28 sps:$4 sm:$0xff]  }
 0x227   : > { %v2636_v2 = vld [vmem:[%s3401_s11 + $0x48] ss:$28 sps:$4 sm:$0xff]  }
 0x228   : > { %v1301_v6 = vsel %vm1285_vm3, %v1279_v47, %v1300_v5  ;;  %v2620_v47 = vld [vmem:[%s3401_s11 + $0x150] ss:$28 sps:$4 sm:$0xff]   ;;  %v2640_v5 = vld [vmem:[%s3401_s11 + $0x80] ss:$28 sps:$4 sm:$0xff]  }
 0x229   : > { %v1302_v8 = vmul.f32 %v1301_v6, %v489_v4  ;;  %2670 = vlog2.f32 %v1301_v6  ;;  %v2072_v17 = vmul.f32 %v1301_v6, %v1301_v6  ;;  %v2642_v4 = vld [vmem:[%s3401_s11 + $0x84] ss:$28 sps:$4 sm:$0xff]  }
 0x22a   : > { %v2643_v6 = vld [vmem:[%s3401_s11 + $0x88] ss:$28 sps:$4 sm:$0xff]  }
 0x22b   : > { %v1303_v9 = vadd.f32 %v1302_v8, %v1168_v7  ;;  %v2646_v7 = vld [vmem:[%s3401_s11 + $0xbc] ss:$28 sps:$4 sm:$0xff]  }
 0x22c   : > { %v2644_v8 = vld [vmem:[%s3401_s11 + $0xb8] ss:$28 sps:$4 sm:$0xff]  }
 0x22d   : > { %v1304_v10 = vpack.c.bf16 %v1303_v9, %v1303_v9  ;;  %v2647_v9 = vld [vmem:[%s3401_s11 + $0xc0] ss:$28 sps:$4 sm:$0xff]  }
 0x22f   : > { %2465 = vmatmul.mubr.msk.bf16.vlgmr.msra.gmra.mrb[12].mxu1 %vm896_vm1, %v1304_v10  ;;  %v2650_v10 = vld [vmem:[%s3401_s11 + $0xf4] ss:$28 sps:$4 sm:$0xff]  }
 0x230   : > { %1755 = vmatpush1.bf16.msra.mxu1 %v2584_v20  ;;  %1786 = vmatprep.mubr.bf16.mxu1 %v2735_v54  ;;  %v2660_v20 = vld [vmem:[%s3401_s11 + $0x198] ss:$28 sps:$4 sm:$0xff]  }
 0x231   : > { %1756 = vmatprep.subr.bf16.mxu1 %v2592_v24  ;;  %v1433_v24 = vsub.s32 0, %v3267_v23 }
 0x233   : > { %v2671_v11 = vpop.eup %2670 }
 0x234   : > { %v2067_v12 = vmul.f32 0.6931472, %v2671_v11  ;;  %1757 = vmatpush1.bf16.msra.mxu1 %v2590_v26  ;;  %v2648_v11 = vld [vmem:[%s3401_s11 + $0xf0] ss:$28 sps:$4 sm:$0xff]   ;;  %v1429_v26 = vld [vmem:[%s3402_s12] sm:$0x7f] }
 0x235   : > { %1758 = vmatprep.subr.bf16.mxu1 %v2598_v28  ;;  %v1445_v28 = vsub.s32 3, %v3267_v23  ;;  %v1434_v29 = vrot.slane %v1429_v26, %v1433_v24  ;;  %v1438_v31 = vrot.slane %v1429_v26, %v1437_v27  ;;  %v2702_v24 = vld [vmem:[%s2924_s20] sm:$0xff] }
 0x236   : > { %v2068_v13 = vmul.f32 2.0, %v2067_v12  ;;  %v2651_v12 = vld [vmem:[%s3401_s11 + $0xf8] ss:$28 sps:$4 sm:$0xff]  }
 0x238   : > { %v2069_v15 = vadd.f32 1.0, %v2068_v13  ;;  %1759 = vmatpush1.bf16.msra.mxu1 %v2596_v30  ;;  %v2654_v13 = vld [vmem:[%s3401_s11 + $0x12c] ss:$28 sps:$4 sm:$0xff]   ;;  %v1442_v30 = vrot.slane %v1429_v26, %v1441_v25 }
 0x239   : > { %1760 = vmatprep.subr.bf16.mxu1 %v2604_v32  ;;  %v1446_v32 = vrot.slane %v1429_v26, %v1445_v28 }
 0x23a   : > { %v2071_v16 = vsub.f32 %v2069_v15, %v2070_v14  ;;  %v2652_v14 = vld [vmem:[%s3401_s11 + $0x128] ss:$28 sps:$4 sm:$0xff]   ;;  %v2655_v15 = vld [vmem:[%s3401_s11 + $0x130] ss:$28 sps:$4 sm:$0xff]  }
 0x23c   : > { %v2073_v18 = vsub.f32 %v2071_v16, %v2072_v17  ;;  %1761 = vmatpush1.bf16.msra.mxu1 %v2602_v34  ;;  %v2658_v16 = vld [vmem:[%s3401_s11 + $0x164] ss:$28 sps:$4 sm:$0xff]  }
 0x23d   : > { %1762 = vmatprep.subr.bf16.mxu1 %v2610_v36  ;;  %v2656_v17 = vld [vmem:[%s3401_s11 + $0x160] ss:$28 sps:$4 sm:$0xff]  }
 0x23e   : > { %v2074_v19 = vsel %vm896_vm1, %v2073_v18, 0.0  ;;  %v2659_v18 = vld [vmem:[%s3401_s11 + $0x168] ss:$28 sps:$4 sm:$0xff]  }
 0x23f   : > { %2075 = vadd.xlane.f32.xlu0 %v2074_v19  ;;  %v2662_v19 = vld [vmem:[%s3401_s11 + $0x19c] ss:$28 sps:$4 sm:$0xff]  }
 0x240   : > { %1763 = vmatpush1.bf16.msra.mxu1 %v2608_v38 }
 0x241   : > { %1764 = vmatprep.subr.bf16.mxu1 %v2616_v40 }
 0x244   : > { %1765 = vmatpush1.bf16.msra.mxu1 %v2614_v42 }
 0x245   : > { %1766 = vmatprep.subr.bf16.mxu1 %v2622_v45 }
 0x248   : > { %1767 = vmatpush1.bf16.msra.mxu1 %v2620_v47 }
 0x249   : > { %1768 = vmatprep.subr.bf16.mxu1 %v2628_v49 }
 0x24c   : > { %1769 = vmatpush1.bf16.msra.mxu1 %v2626_v51 }
 0x24d   : > { %1836 = vmatprep.subr.bf16.mxu1 %v2634_v53 }
 0x302   : > { %v1357_v56 = vpop.f32.mrb[12].mxu1 }
 0x303   : > { %v1358_v57 = vadd.f32 %v2256_v55, %v1357_v56  ;;  %v2466_v58 = vpop.f32.mrb[13].mxu1 }
 0x304   : > { %v1360_v59 = vpop.f32.mrb[14].mxu1 }
 0x305   : > { %2672 = vtanh.f32 %v1358_v57  ;;  %v2467_v60 = vpop.f32.mrb[15].mxu1 }
 0x30f   : > { %v2673_v61 = vpop.eup %2672 }
 0x310   : > { %v1364_v0 = vpack.c.bf16 %v2673_v61, %v2673_v61 }
 0x312   : > { %1787 = vmatmul.mubr.bf16.vlgmr.msra.gmra.mrb[16].mxu1 %v1364_v0  ;;  %1828 = vmatmul.mubr.bf16.vlgmr.msra.gmra.mrb[12].mxu0 %v1364_v0 }
 0x313   : > { %1837 = vmatpush1.bf16.msra.mxu1 %v2632_v62  ;;  %2469 = vmatpush3.bf16.msra.mxu0 %v2635_v63 }
 0x314   : > { %1838 = vmatprep.subr.bf16.mxu1 %v2638_v1  ;;  %2470 = vmatprep.subr.bf16.mxu0 %v2733_v44 }
 0x315   : > { %1868 = vmatprep.mubr.bf16.mxu1 %v2735_v54  ;;  %2484 = vmatprep.mubr.msk.bf16.mxu0 %vm2734_vm0, %v2733_v44 }
 0x317   : > { %1839 = vmatpush1.bf16.msra.mxu1 %v2636_v2  ;;  %2471 = vmatpush3.bf16.msra.mxu0 %v2639_v3  ;;  %v1449_v3 = vsub.s32 4, %v3267_v23 }
 0x318   : > { %1840 = vmatprep.subr.bf16.mxu1 %v2642_v4  ;;  %2472 = vmatprep.subr.bf16.mxu0 %v2733_v44  ;;  %v1457_v4 = vsub.s32 6, %v3267_v23 }
 0x31b   : > { %1841 = vmatpush1.bf16.msra.mxu1 %v2640_v5  ;;  %2473 = vmatpush3.bf16.msra.mxu0 %v2643_v6  ;;  %v1453_v6 = vsub.s32 5, %v3267_v23 }
 0x31c   : > { %1842 = vmatprep.subr.bf16.mxu1 %v2646_v7  ;;  %2474 = vmatprep.subr.bf16.mxu0 %v2733_v44 }
 0x31f   : > { %1843 = vmatpush1.bf16.msra.mxu1 %v2644_v8  ;;  %2475 = vmatpush3.bf16.msra.mxu0 %v2647_v9 }
 0x320   : > { %1844 = vmatprep.subr.bf16.mxu1 %v2650_v10  ;;  %2476 = vmatprep.subr.bf16.mxu0 %v2733_v44 }
 0x323   : > { %1845 = vmatpush1.bf16.msra.mxu1 %v2648_v11  ;;  %2477 = vmatpush3.bf16.msra.mxu0 %v2651_v12  ;;  %v1450_v11 = vrot.slane %v1429_v26, %v1449_v3  ;;  %v1458_v12 = vrot.slane %v1429_v26, %v1457_v4 }
 0x324   : > { %1846 = vmatprep.subr.bf16.mxu1 %v2654_v13  ;;  %2478 = vmatprep.subr.bf16.mxu0 %v2733_v44 }
 0x327   : > { %1847 = vmatpush1.bf16.msra.mxu1 %v2652_v14  ;;  %2479 = vmatpush3.bf16.msra.mxu0 %v2655_v15 }
 0x328   : > { %1848 = vmatprep.subr.bf16.mxu1 %v2658_v16  ;;  %2480 = vmatprep.subr.bf16.mxu0 %v2733_v44  ;;  %v1454_v16 = vrot.slane %v1429_v26, %v1453_v6 }
 0x32b   : > { %1849 = vmatpush1.bf16.msra.mxu1 %v2656_v17  ;;  %2481 = vmatpush3.bf16.msra.mxu0 %v2659_v18 }
 0x32c   : > { %1850 = vmatprep.subr.bf16.mxu1 %v2662_v19  ;;  %2482 = vmatprep.subr.bf16.mxu0 %v2733_v44 }
 0x32f   : > { %1851 = vmatpush1.bf16.msra.mxu1 %v2660_v20  ;;  %2483 = vmatpush3.bf16.msra.mxu0 %v2663_v21 }
 0x332   : > { %1869 = vmatmul.mubr.bf16.vlgmr.msra.gmra.mrb[20].mxu1 %v1364_v0  ;;  %2485 = vmatmul.mubr.bf16.vlgmr.msra.gmra.mrb[16].mxu0 %v1364_v0 }
 0x3e5   : > { %v1788_v33 = vpop.f32.mrb[16].mxu1  ;;  %v1829_v34 = vpop.f32.mrb[12].mxu0 }
 0x3e6   : > { %v3276_v35 = vadd.f32 %v1788_v33, %v1434_v29  ;;  %v3278_v36 = vadd.f32 %v1829_v34, %v1442_v30  ;;  %v1790_v37 = vpop.f32.mrb[17].mxu1  ;;  %v1831_v38 = vpop.f32.mrb[13].mxu0 }
 0x3e7   : > { %v3280_v39 = vadd.f32 %v1790_v37, %v1438_v31  ;;  %v3282_v40 = vadd.f32 %v1831_v38, %v1446_v32  ;;  %v1792_v41 = vpop.f32.mrb[18].mxu1  ;;  %v1833_v42 = vpop.f32.mrb[14].mxu0 }
 0x3e8   : > { %v1938_v43 = vand.u32 2147483647, %v3276_v35  ;;  %v1793_v45 = vpop.f32.mrb[19].mxu1  ;;  %v1834_v46 = vpop.f32.mrb[15].mxu0  ;;  %v1940_v47 = vand.u32 2147483647, %v3278_v36  ;;  %vm1924_vm4 = vcmp.ne.f32.partialorder %v3276_v35, %v3276_v35  ;;  %v3305_v25 = vmul.f32 %v2702_v24, %v3276_v35 }
 0x3e9   : > { %v1939_v49 = vand.u32 2147483647, %v3280_v39  ;;  %v1941_v51 = vand.u32 2147483647, %v3282_v40  ;;  %v1917_v13 = vmax.f32 %v3276_v35, 0.0  ;;  %v1919_v17 = vmax.f32 %v3278_v36, 0.0 }
 0x3ea   : > { %v1945_v48 = vsub.f32 0.0, %v1938_v43  ;;  %v1947_v50 = vsub.f32 0.0, %v1940_v47  ;;  %v1918_v18 = vmax.f32 %v3280_v39, 0.0  ;;  %vm1926_vm8 = vcmp.ne.f32.partialorder %v3278_v36, %v3278_v36 }
 0x3eb   : > { %v1946_v53 = vsub.f32 0.0, %v1939_v49  ;;  %v1948_v55 = vsub.f32 0.0, %v1941_v51  ;;  %vm1925_vm9 = vcmp.ne.f32.partialorder %v3280_v39, %v3280_v39  ;;  %vm1927_vm11 = vcmp.ne.f32.partialorder %v3282_v40, %v3282_v40 }
 0x3ec   : > { %v1952_v52 = vmul.f32 1.442695, %v1945_v48  ;;  %v1956_v54 = vmul.f32 1.442695, %v1947_v50 }
 0x3ed   : > { %v1954_v56 = vmul.f32 1.442695, %v1946_v53  ;;  %v1958_v57 = vmul.f32 1.442695, %v1948_v55 }
 0x3ee   : > { %2674 = vpow2.f32 %v1952_v52 }
 0x3ef   : > { %2676 = vpow2.f32 %v1956_v54 }
 0x3f0   : > { %2678 = vpow2.f32 %v1954_v56 }
 0x3f1   : > { %2680 = vpow2.f32 %v1958_v57 }
 0x3f8   : > { %v2675_v58 = vpop.eup %2674 }
 0x3f9   : > { %v2677_v59 = vpop.eup %2676  ;;  %v1966_v60 = vadd.f32 1.0, %v2675_v58  ;;  %v1969_v1 = vmul.f32 -0.5, %v2675_v58  ;;  %v1972_v9 = vand.u32 2147483647, %v2675_v58 }
 0x3fa   : > { %v2679_v61 = vpop.eup %2678  ;;  %v1984_v62 = vadd.f32 1.0, %v2677_v59  ;;  %v1987_v5 = vmul.f32 -0.5, %v2677_v59  ;;  %v1990_v10 = vand.u32 2147483647, %v2677_v59 }
 0x3fb   : > { %v3288_v63 = vpop.eup %2680  ;;  %2682 = vlog2.f32 %v1966_v60  ;;  %v1975_v0 = vadd.f32 1.0, %v2679_v61  ;;  %v1978_v7 = vmul.f32 -0.5, %v2679_v61  ;;  %v1970_v8 = vadd.f32 1.0, %v1969_v1 }
 0x3fc   : > { %2684 = vlog2.f32 %v1984_v62  ;;  %v1993_v2 = vadd.f32 1.0, %v3288_v63  ;;  %v1988_v14 = vadd.f32 1.0, %v1987_v5  ;;  %v1981_v15 = vand.u32 2147483647, %v2679_v61 }
 0x3fd   : > { %2686 = vlog2.f32 %v1975_v0  ;;  %v1979_v19 = vadd.f32 1.0, %v1978_v7  ;;  %v1971_v21 = vmul.f32 %v2675_v58, %v1970_v8  ;;  %vm3299_vm5 = vcmp.lt.f32.partialorder %v1972_v9, 0.0004427343  ;;  %v2703_v7 = vld [vmem:[%s2924_s20 + $0x8] sm:$0xff] }
 0x3fe   : > { %2688 = vlog2.f32 %v1993_v2  ;;  %vm3307_vm6 = vcmp.lt.f32.partialorder %v1990_v10, 0.0004427343  ;;  %v1996_v37 = vmul.f32 -0.5, %v3288_v63  ;;  %v1989_v42 = vmul.f32 %v2677_v59, %v1988_v14 }
 0x3ff   : > { %vm3316_vm7 = vcmp.lt.f32.partialorder %v1981_v15, 0.0004427343  ;;  %v1980_v50 = vmul.f32 %v2679_v61, %v1979_v19  ;;  %v1999_v61 = vand.u32 2147483647, %v3288_v63  ;;  %v2044_v8 = vmul.f32 %v2703_v7, %v3280_v39  ;;  %v2704_v15 = vld [vmem:[%s2924_s20 + $0x10] sm:$0xff]  ;;  %v2705_v19 = vld [vmem:[%s2924_s20 + $0x18] sm:$0xff] }
 0x400   : > { %v1997_v60 = vadd.f32 1.0, %v1996_v37 }
 0x401   : > { %vm2000_vm10 = vcmp.lt.f32.partialorder %v1999_v61, 0.0004427343 }
 0x405   : > { %v2683_v20 = vpop.eup %2682  ;;  %v1870_v27 = vpop.f32.mrb[20].mxu1 }
 0x406   : > { %v1911_v28 = vpop.f32.mrb[16].mxu0  ;;  %v2685_v29 = vpop.eup %2684  ;;  %v1968_v30 = vmul.f32 0.6931472, %v2683_v20  ;;  %v3311_v31 = vadd.f32 %v1870_v27, %v1450_v11  ;;  %v1920_v11 = vmax.f32 %v3282_v40, 0.0  ;;  %v2046_v20 = vmul.f32 %v2705_v19, %v3282_v40 }
 0x407   : > { %v3313_v32 = vadd.f32 %v1911_v28, %v1458_v12  ;;  %v1872_v33 = vpop.f32.mrb[21].mxu1  ;;  %v2486_v34 = vpop.f32.mrb[17].mxu0  ;;  %v1986_v41 = vmul.f32 0.6931472, %v2685_v29  ;;  %v1998_v12 = vmul.f32 %v3288_v63, %v1997_v60 }
 0x408   : > { %v2687_v38 = vpop.eup %2686  ;;  %v3320_v45 = vadd.f32 %v1872_v33, %v1454_v16  ;;  %v1874_v46 = vpop.f32.mrb[22].mxu1  ;;  %v1974_v48 = vsel %vm3299_vm5, %v1971_v21, %v1968_v30  ;;  %v1942_v51 = vand.u32 2147483647, %v3311_v31  ;;  %v2045_v16 = vmul.f32 %v2704_v15, %v3278_v36 }
 0x409   : > { %v1914_v47 = vpop.f32.mrb[18].mxu0  ;;  %v1977_v49 = vmul.f32 0.6931472, %v2687_v38  ;;  %v1875_v52 = vpop.f32.mrb[23].mxu1  ;;  %v2029_v53 = vadd.f32 %v1974_v48, %v1917_v13  ;;  %v1992_v54 = vsel %vm3307_vm6, %v1989_v42, %v1986_v41  ;;  %v1944_v55 = vand.u32 2147483647, %v3313_v32 }
 0x40a   : > { %v1943_v56 = vand.u32 2147483647, %v3320_v45  ;;  %v2487_v57 = vpop.f32.mrb[19].mxu0  ;;  %v1949_v59 = vsub.f32 0.0, %v1942_v51  ;;  %v2689_v62 = vpop.eup %2688  ;;  %v2031_v0 = vadd.f32 %v1992_v54, %v1919_v17  ;;  %v1923_v54 = vmax.f32 %v3313_v32, 0.0 }
 0x40b   : > { %v1983_v58 = vsel %vm3316_vm7, %v1980_v50, %v1977_v49  ;;  %v1951_v2 = vsub.f32 0.0, %v1944_v55  ;;  %v2036_v4 = vsel %vm1924_vm4, %v3276_v35, %v2029_v53  ;;  %v1995_v35 = vmul.f32 0.6931472, %v2689_v62 }
 0x40c   : > { %v2030_v1 = vadd.f32 %v1983_v58, %v1918_v18  ;;  %v1950_v3 = vsub.f32 0.0, %v1943_v56  ;;  %v1960_v5 = vmul.f32 1.442695, %v1949_v59  ;;  %v2038_v13 = vsel %vm1926_vm8, %v3278_v36, %v2031_v0 }
 0x40d   : > { %v1964_v9 = vmul.f32 1.442695, %v1951_v2  ;;  %v2050_v14 = vsub.f32 %v2036_v4, %v3305_v25  ;;  %v2052_v63 = vsub.f32 %v2038_v13, %v2045_v16  ;;  %v1921_v50 = vmax.f32 %v3311_v31, 0.0  ;;  %v2706_v2 = vld [vmem:[%s2924_s20 + $0x20] sm:$0xff] }
 0x40e   : > { %v2037_v6 = vsel %vm1925_vm9, %v3280_v39, %v2030_v1  ;;  %v1962_v10 = vmul.f32 1.442695, %v1950_v3  ;;  %2690 = vpow2.f32 %v1960_v5  ;;  %v2001_v39 = vsel %vm2000_vm10, %v1998_v12, %v1995_v35 }
 0x40f   : > { %2692 = vpow2.f32 %v1964_v9  ;;  %v2051_v17 = vsub.f32 %v2037_v6, %v2044_v8  ;;  %v2032_v18 = vadd.f32 %v2001_v39, %v1920_v11  ;;  %v1922_v60 = vmax.f32 %v3320_v45, 0.0  ;;  %v2707_v6 = vld [vmem:[%s2924_s20 + $0x30] sm:$0xff]  ;;  %v2708_v9 = vld [vmem:[%s2924_s20 + $0x28] sm:$0xff] }
 0x410   : > { %2694 = vpow2.f32 %v1962_v10  ;;  %vm1928_vm15 = vcmp.ne.f32.partialorder %v3311_v31, %v3311_v31  ;;  %v2047_v3 = vmul.f32 %v2706_v2, %v3311_v31  ;;  %vm1930_vm0 = vcmp.ne.f32.partialorder %v3313_v32, %v3313_v32 }
 0x411   : > { %v2057_v21 = vadd.f32 %v2051_v17, %v2050_v14  ;;  %v2039_v22 = vsel %vm1927_vm11, %v3282_v40, %v2032_v18  ;;  %v2049_v7 = vmul.f32 %v2707_v6, %v3313_v32  ;;  %vm1929_vm2 = vcmp.ne.f32.partialorder %v3320_v45, %v3320_v45  ;;  %v2076_v18 = vpop.xlane.xlu0 %2075 }
 0x412   : > { %v2053_v24 = vsub.f32 %v2039_v22, %v2046_v20  ;;  %v2048_v10 = vmul.f32 %v2708_v9, %v3320_v45  ;;  %v2082_v39 = vstv %s2315_s17  ;;  %v2085_v17 = vstv %s2084_s16 }
 0x413   : > { %v2058_v26 = vadd.f32 %v2057_v21, %v2052_v63  ;;  %v2077_v19 = vmul.f32 -0.5, %v2076_v18  ;;  %vm2091_vm4 = vcmask 7168  }
 0x415   : > { %v2059_v25 = vadd.f32 %v2058_v26, %v2053_v24 }
 0x418   : > { %v2691_v27 = vpop.eup %2690 }
 0x419   : > { %v2693_v28 = vpop.eup %2692  ;;  %v2002_v36 = vadd.f32 1.0, %v2691_v27  ;;  %v2005_v34 = vmul.f32 -0.5, %v2691_v27  ;;  %v2008_v42 = vand.u32 2147483647, %v2691_v27 }
 0x41a   : > { %v2695_v29 = vpop.eup %2694  ;;  %v2020_v30 = vadd.f32 1.0, %v2693_v28  ;;  %v2023_v37 = vmul.f32 -0.5, %v2693_v28  ;;  %v2026_v40 = vand.u32 2147483647, %v2693_v28 }
 0x41b   : > { %2696 = vlog2.f32 %v2002_v36  ;;  %v2011_v33 = vadd.f32 1.0, %v2695_v29  ;;  %v2014_v38 = vmul.f32 -0.5, %v2695_v29  ;;  %v2006_v41 = vadd.f32 1.0, %v2005_v34 }
 0x41c   : > { %2698 = vlog2.f32 %v2020_v30  ;;  %v2024_v43 = vadd.f32 1.0, %v2023_v37  ;;  %v2017_v48 = vand.u32 2147483647, %v2695_v29  ;;  %vm2009_vm12 = vcmp.lt.f32.partialorder %v2008_v42, 0.0004427343 }
 0x41d   : > { %2700 = vlog2.f32 %v2011_v33  ;;  %v2015_v46 = vadd.f32 1.0, %v2014_v38  ;;  %v2007_v52 = vmul.f32 %v2691_v27, %v2006_v41  ;;  %vm2027_vm13 = vcmp.lt.f32.partialorder %v2026_v40, 0.0004427343 }
 0x41e   : > { %v2025_v56 = vmul.f32 %v2693_v28, %v2024_v43  ;;  %vm2018_vm14 = vcmp.lt.f32.partialorder %v2017_v48, 0.0004427343 }
 0x41f   : > { %v2016_v59 = vmul.f32 %v2695_v29, %v2015_v46 }
 0x425   : > { %v2697_v47 = vpop.eup %2696 }
 0x426   : > { %v2699_v49 = vpop.eup %2698  ;;  %v2004_v51 = vmul.f32 0.6931472, %v2697_v47 }
 0x427   : > { %v2701_v53 = vpop.eup %2700  ;;  %v2022_v55 = vmul.f32 0.6931472, %v2699_v49 }
 0x428   : > { %v2010_v57 = vsel %vm2009_vm12, %v2007_v52, %v2004_v51  ;;  %v2013_v58 = vmul.f32 0.6931472, %v2701_v53 }
 0x429   : > { %v2028_v61 = vsel %vm2027_vm13, %v2025_v56, %v2022_v55  ;;  %v2033_v62 = vadd.f32 %v2010_v57, %v1921_v50 }
 0x42a   : > { %v2019_v0 = vsel %vm2018_vm14, %v2016_v59, %v2013_v58  ;;  %v2035_v1 = vadd.f32 %v2028_v61, %v1923_v54 }
 0x42b   : > { %v2034_v4 = vadd.f32 %v2019_v0, %v1922_v60  ;;  %v2040_v5 = vsel %vm1928_vm15, %v3311_v31, %v2033_v62 }
 0x42c   : > { %v2042_v8 = vsel %vm1930_vm0, %v3313_v32, %v2035_v1  ;;  %v2054_v11 = vsub.f32 %v2040_v5, %v2047_v3  ;;  %v2083_v32 = vadd.s32 %v2082_v39, %v3267_v23 }
 0x42d   : > { %v2041_v35 = vsel %vm1929_vm2, %v3320_v45, %v2034_v4  ;;  %v2056_v12 = vsub.f32 %v2042_v8, %v2049_v7 }
 0x42e   : > { %v2055_v13 = vsub.f32 %v2041_v35, %v2048_v10  ;;  %v2060_v14 = vadd.f32 %v2059_v25, %v2054_v11  ;;  %vm2086_vm3 = vcmp.lt.s32.totalorder %v2083_v32, %v2085_v17 }
 0x42f   : > { %v2062_v31 = vsel %vm896_vm1, %v2056_v12, 0.0  ;;  %v2316_v45 = vsel %vm2086_vm3, 1.0, %v2733_v44  ;;  %vm2106_vm1 = vcmask 0  }
 0x430   : > { %v2061_v15 = vadd.f32 %v2060_v14, %v2055_v13  ;;  %2107 = vst.msk [vmem:[%s480_s19] sm:$0x1] %vm2106_vm1, %v2733_v44 }
 0x432   : > { %v2063_v16 = vadd.f32 %v2062_v31, %v2061_v15 }
 0x434   : > { %2064 = vadd.xlane.f32.xlu0 %v2063_v16 }
 0x437   : > { %v2108_v29 = vld [vmem:[%s480_s19] sm:$0x1] }
 0x4c1   : > { %v2065_v20 = vpop.xlane.xlu0 %2064 }
 0x4c2   : > { %v2089_v63 = vadd.f32 %v2077_v19, %v2065_v20 }
 0x4c4   : > { %v2090_v21 = vmul.f32 %v2316_v45, %v2089_v63 }
 0x4c6   : > { %v2092_v22 = vsel %vm2091_vm4, %v2090_v21, 0.0 }
 0x4c7   : > { %2093 = vadd.xlane.f32.xlu1 %v2092_v22 }
 0x554   : > { %v2094_v23 = vpop.xlane.xlu1 %2093 }
 0x555   : > { %v2095_v24 = vrot.slane %v2094_v23, 4 }
 0x557   : > { %v2096_v26 = vadd.f32 %v2095_v24, %v2094_v23 }
 0x559   : > { %v2097_v25 = vrot.slane %v2096_v26, 2 }
 0x55b   : > { %v2098_v27 = vadd.f32 %v2097_v25, %v2096_v26 }
 0x55d   : > { %v2099_v28 = vrot.slane %v2098_v27, 1 }
 0x55f   : > { %v2100_v36 = vadd.f32 %v2099_v28, %v2098_v27 }
 0x561   : > { %2489 = vpush %v2100_v36 }
 0x592   : > { %s2490_s27 = spop %2489 }
 0x593   : > { %v2109_v30 = vstv %s2490_s27 }
 0x594   : > { %v2110_v33 = vadd.f32 %v2109_v30, %v2108_v29 }
 0x596   : > { %2112 = vst.msk [vmem:[%s480_s19] sm:$0x1] %vm2106_vm1, %v2110_v33 }
 0x597 PF: > { %s24_s29 = sadd.s32 1, %s2731_s29   ;;  %s3410_s27 = smov %s2727_s28 }
 0x598   : > { %p21_p5 = scmp.ge.s32.totalorder %s24_s29, 4   ;;  %s3411_s28 = smov %s3413_s0 }
 0x59a   :  { %23 = sbr.rel (!%p21_p5) target bundleno = 2 (0x2), region = 109 }

</bundles_post_ra>
